<compile_context>
chip_gen: v7x
topology: tpu7x:2x2x1
jax: 0.10.0
libtpu: 0.0.40
codegen_flags: <defaults>
</compile_context>

<pallas_src>
import jax
import jax.numpy as jnp
from jax import lax
from jax.experimental import pallas as pl
from jax.experimental.pallas import tpu as pltpu

LANE = 128      # f32 lane width
SUBLANE = 8     # f32 sublane count


def _round_up(x, m):
    return ((x + m - 1) // m) * m


def _rnn_chunk_kernel(x_ref, c0_ref, w_ref, out_ref, hfinal_ref, c_ref):
    """One grid step = TS time steps of the recurrence.

    Carried combined buffer c_ref (B_pad, C_PAD), lane layout:
        [0:H)     hidden state
        [H:H+I)   current input x_t
        [H+I]     constant 1.0  (bias folded into the matmul)
        rest      zeros
    Fused weight w_ref (C_PAD, OUT_PAD + H_PAD), column layout:
        [0:OUT_PAD)          output head (O real cols, zero padded to 128)
        [OUT_PAD:OUT_PAD+H)  hidden head (rest zero padded)
    """
    ts = x_ref.shape[0]
    isz = x_ref.shape[2]
    hsz = hfinal_ref.shape[1]
    out_pad = out_ref.shape[2]

    # Seed the carried combined state once, at the first chunk.
    @pl.when(pl.program_id(0) == 0)
    def _():
        c_ref[...] = c0_ref[...]

    def step(t, carry):
        # Drop x_t into its lanes of the combined buffer (masked store, no concat).
        c_ref[:, pl.ds(hsz, isz)] = x_ref[t]
        # Single MXU pass: [output | new_hidden] = combined @ W_fused (bias folded in).
        # Output uses the pre-update hidden, matching the PyTorch module.
        fused = jnp.dot(c_ref[...], w_ref[...], preferred_element_type=jnp.float32)
        out_ref[t] = fused[:, :out_pad].astype(out_ref.dtype)
        # Carry the new hidden for the next step.
        c_ref[:, pl.ds(0, hsz)] = fused[:, out_pad:out_pad + hsz].astype(c_ref.dtype)
        return carry

    lax.fori_loop(0, ts, step, 0, unroll=True)

    # Final hidden of this chunk; the last grid step's write is what lands in HBM.
    hfinal_ref[...] = c_ref[:, pl.ds(0, hsz)].astype(hfinal_ref.dtype)


def rnn_forward_sequence(x_seq, h0, fused_w, *, input_size, hidden_size,
                         output_size, time_chunk=4):
    """Run the RNN cell over a whole sequence in ONE kernel launch.

    x_seq   : (T, B, I)          h0 : (B, H)
    fused_w : (C_PAD, OUT_PAD + H_PAD)  from fuse_params()
    returns (outputs (T, B, O), final_hidden (B, H))
    """
    T, B, I = x_seq.shape
    H = hidden_size
    O = output_size
    C_PAD = fused_w.shape[0]
    OUT_PAD = LANE
    N = fused_w.shape[1]

    B_pad = max(SUBLANE, _round_up(B, SUBLANE))

    # Largest divisor of T that is <= time_chunk (keeps the grid exact).
    TS = min(time_chunk, T)
    while T % TS:
        TS -= 1
    n_chunks = T // TS

    # Pad batch so every f32 vreg sublane is occupied.
    x_p = jnp.zeros((T, B_pad, I), jnp.float32).at[:, :B, :].set(x_seq.astype(jnp.float32))
    # Initial combined buffer [hidden | x | 1 | 0...]; x lanes are filled in-kernel.
    c0 = jnp.zeros((B_pad, C_PAD), jnp.float32)
    c0 = c0.at[:B, :H].set(h0.astype(jnp.float32))
    c0 = c0.at[:, H + I].set(1.0)

    out_padded, hfinal = pl.pallas_call(
        _rnn_chunk_kernel,
        out_shape=(
            jax.ShapeDtypeStruct((T, B_pad, OUT_PAD), jnp.float32),
            jax.ShapeDtypeStruct((B_pad, H), jnp.float32),
        ),
        grid_spec=pltpu.PrefetchScalarGridSpec(
            num_scalar_prefetch=0,
            grid=(n_chunks,),
            in_specs=[
                pl.BlockSpec((TS, B_pad, I), lambda c: (c, 0, 0)),   # x chunk (pipelined)
                pl.BlockSpec((B_pad, C_PAD), lambda c: (0, 0)),      # c0 (resident)
                pl.BlockSpec((C_PAD, N), lambda c: (0, 0)),          # fused weight (resident)
            ],
            out_specs=[
                pl.BlockSpec((TS, B_pad, OUT_PAD), lambda c: (c, 0, 0)),  # lane-dense outputs
                pl.BlockSpec((B_pad, H), lambda c: (0, 0)),               # final hidden
            ],
            scratch_shapes=[pltpu.VMEM((B_pad, C_PAD), jnp.float32)],     # carried [h|x|1]
        ),
        compiler_params=pltpu.CompilerParams(
            dimension_semantics=("arbitrary",),   # the recurrence is serial in time
            vmem_limit_bytes=32 * 1024 * 1024,    # safe on v5e/v6e/v7x
        ),
        # TODO(synk): on v7x with large batch, add a leading "parallel" grid axis
        # splitting the batch across the two TensorCores (each carries its own
        # combined-scratch slice).  Not useful at B=2.
    )(x_p, c0, fused_w)

    outputs = out_padded[:, :B, :O]        # lane-0-aligned slices
    final_hidden = hfinal[:B, :]
    return outputs, final_hidden


def rnn_step(x, hidden, fused_w, *, input_size, hidden_size, output_size):
    """Single-step forward matching module.forward(input, hidden)."""
    outputs, new_hidden = rnn_forward_sequence(
        x[None], hidden, fused_w,
        input_size=input_size, hidden_size=hidden_size, output_size=output_size,
        time_chunk=1)
    return outputs[0], new_hidden


def init_params(key, input_size, hidden_size, output_size):
    """nn.Linear-style init (uniform +/- 1/sqrt(fan_in)); weights stored as W.T."""
    in_features = input_size + hidden_size
    bound = 1.0 / jnp.sqrt(jnp.float32(in_features))
    k_wh, k_bh, k_wo, k_bo = jax.random.split(key, 4)
    wh = jax.random.uniform(k_wh, (in_features, hidden_size), jnp.float32, -bound, bound)
    bh = jax.random.uniform(k_bh, (1, hidden_size), jnp.float32, -bound, bound)
    wo = jax.random.uniform(k_wo, (in_features, output_size), jnp.float32, -bound, bound)
    bo = jax.random.uniform(k_bo, (1, output_size), jnp.float32, -bound, bound)
    return wh, bh, wo, bo


def fuse_params(wh, bh, wo, bo, input_size, hidden_size):
    """Build the fused, lane-padded weight with the bias folded in as an extra row.

    Inputs are in x@W form on the concat(x, h) axis:
        wh : (I+H, H)  bh : (1, H)    (hidden_state_layer)
        wo : (I+H, O)  bo : (1, O)    (output_layer)
    Row layout matches the combined buffer [hidden | x | 1 | pad]; column layout
    is [output (padded to 128) | hidden (padded to 128)].  Padded entries are
    exactly zero so the in-kernel hidden slice is unaffected.
    """
    I, H = input_size, hidden_size
    O = wo.shape[1]
    C_PAD = _round_up(I + H + 1, LANE)
    OUT_PAD = LANE
    H_PAD = _round_up(H, LANE)
    W = jnp.zeros((C_PAD, OUT_PAD + H_PAD), jnp.float32)
    # hidden rows
    W = W.at[:H, :O].set(wo[I:I + H])
    W = W.at[:H, OUT_PAD:OUT_PAD + H].set(wh[I:I + H])
    # x rows
    W = W.at[H:H + I, :O].set(wo[:I])
    W = W.at[H:H + I, OUT_PAD:OUT_PAD + H].set(wh[:I])
    # bias row (multiplied by the constant-1 lane of the combined buffer)
    W = W.at[H + I, :O].set(bo[0])
    W = W.at[H + I, OUT_PAD:OUT_PAD + H].set(bh[0])
    return W


if __name__ == "__main__":
    input_size = 4
    hidden_size = 32
    output_size = 2
    batch = 2
    seq_len = 8

    key = jax.random.PRNGKey(0)
    k_params, k_x = jax.random.split(key)

    wh, bh, wo, bo = init_params(k_params, input_size, hidden_size, output_size)
    W_fused = fuse_params(wh, bh, wo, bo, input_size, hidden_size)

    x_seq = jax.random.normal(k_x, (seq_len, batch, input_size), jnp.float32)
    h0 = jnp.zeros((batch, hidden_size), jnp.float32)   # init_hidden()

    # One kernel launch for the whole sequence (grid chunks the time axis).
    outputs, final_hidden = rnn_forward_sequence(
        x_seq, h0, W_fused,
        input_size=input_size, hidden_size=hidden_size, output_size=output_size,
        time_chunk=4)
    jax.block_until_ready((outputs, final_hidden))

    # Pure-JAX reference: step-by-step recurrence in the original
    # (concat -> two separate Linears) formulation.
    h = h0
    ref_outs = []
    for t in range(seq_len):
        combined = jnp.concatenate([x_seq[t], h], axis=1)
        ref_outs.append(combined @ wo + bo)
        h = combined @ wh + bh
    ref_outs = jnp.stack(ref_outs)

    assert jnp.allclose(outputs, ref_outs, atol=1e-5), "sequence output mismatch"
    assert jnp.allclose(final_hidden, h, atol=1e-5), "final hidden mismatch"

    # Single-step API matching forward(input, hidden).
    out1, h1 = rnn_step(x_seq[0], h0, W_fused, input_size=input_size,
                        hidden_size=hidden_size, output_size=output_size)
    jax.block_until_ready((out1, h1))
    combined0 = jnp.concatenate([x_seq[0], h0], axis=1)
    assert jnp.allclose(out1, combined0 @ wo + bo, atol=1e-5), "step output mismatch"
    assert jnp.allclose(h1, combined0 @ wh + bh, atol=1e-5), "step hidden mismatch"

    # TODO(synk): optim.Adam / .lr belong to training, not the forward pass.
    print("KERNEL_OK")
</pallas_src>

<mosaic_0001>
module attributes {stable_mosaic.version = 11 : i64} {
  func.func @_rnn_chunk_kernel(%arg0: i32, %arg1: memref<4x8x4xf32, #tpu.memory_space<vmem>>, %arg2: memref<8x128xf32, #tpu.memory_space<vmem>>, %arg3: memref<128x256xf32, #tpu.memory_space<vmem>>, %arg4: memref<4x8x128xf32, #tpu.memory_space<vmem>>, %arg5: memref<8x32xf32, #tpu.memory_space<vmem>>, %arg6: memref<8x128xf32, #tpu.memory_space<vmem>>) attributes {dimension_semantics = [#tpu.dimension_semantics<arbitrary>], iteration_bounds = array<i64: 2>, scalar_prefetch = 0 : i64, scratch_operands = 1 : i64, tpu.core_type = #tpu.core_type<tc>, window_params = [{transform_indices = @transform_0, window_bounds = array<i64: 4, 8, 4>}, {pipeline_mode = #tpu.pipeline_mode<synchronous>, transform_indices = @transform_1, window_bounds = array<i64: 8, 128>}, {pipeline_mode = #tpu.pipeline_mode<synchronous>, transform_indices = @transform_2, window_bounds = array<i64: 128, 256>}, {transform_indices = @transform_3, window_bounds = array<i64: 4, 8, 128>}, {pipeline_mode = #tpu.pipeline_mode<synchronous>, transform_indices = @transform_4, window_bounds = array<i64: 8, 32>}]} {
    %c0_i32 = arith.constant 0 : i32
    %0 = arith.cmpi eq, %arg0, %c0_i32 : i32
    %1 = arith.extui %0 : i1 to i32
    %c0_i32_0 = arith.constant 0 : i32
    %2 = arith.cmpi ne, %1, %c0_i32_0 : i32
    scf.if %2 {
      %c0_55 = arith.constant 0 : index
      %c0_56 = arith.constant 0 : index
      %61 = vector.load %arg2[%c0_55, %c0_56] : memref<8x128xf32, #tpu.memory_space<vmem>>, vector<8x128xf32>
      %c0_57 = arith.constant 0 : index
      %c0_58 = arith.constant 0 : index
      %62 = vector.load %arg6[%c0_57, %c0_58] : memref<8x128xf32, #tpu.memory_space<vmem>>, vector<8x128xf32>
      tpu.vector_store %arg6[%c0_57, %c0_58], %61 {strides = array<i32>} : memref<8x128xf32, #tpu.memory_space<vmem>>, vector<8x128xf32>,
    } else {
    }
    %c0_i32_1 = arith.constant 0 : i32
    %3 = arith.index_cast %c0_i32_1 : i32 to index
    %c0 = arith.constant 0 : index
    %c0_2 = arith.constant 0 : index
    %4 = vector.load %arg1[%3, %c0, %c0_2] : memref<4x8x4xf32, #tpu.memory_space<vmem>>, vector<1x8x4xf32>
    %5 = vector.shape_cast %4 : vector<1x8x4xf32> to vector<8x4xf32>
    %c0_3 = arith.constant 0 : index
    %c32 = arith.constant 32 : index
    %6 = vector.load %arg6[%c0_3, %c32] : memref<8x128xf32, #tpu.memory_space<vmem>>, vector<8x4xf32>
    tpu.vector_store %arg6[%c0_3, %c32], %5 {strides = array<i32>} : memref<8x128xf32, #tpu.memory_space<vmem>>, vector<8x4xf32>,
    %c0_4 = arith.constant 0 : index
    %c0_5 = arith.constant 0 : index
    %7 = vector.load %arg6[%c0_4, %c0_5] : memref<8x128xf32, #tpu.memory_space<vmem>>, vector<8x128xf32>
    %c0_6 = arith.constant 0 : index
    %c0_7 = arith.constant 0 : index
    %8 = vector.load %arg3[%c0_6, %c0_7] : memref<128x256xf32, #tpu.memory_space<vmem>>, vector<128x256xf32>
    %cst = arith.constant dense<0.000000e+00> : vector<8x256xf32>
    %9 = tpu.matmul %7, %8, %cst {dimension_numbers = #tpu.dot_dimension_numbers<[1], [0], [0], [1], [0, 0, 1, 1], [], []>} : vector<8x128xf32>, vector<128x256xf32>, vector<8x256xf32> -> vector<8x256xf32>
    %10 = vector.extract_strided_slice %9 {offsets = [0, 0], sizes = [8, 128], strides = [1, 1]} : vector<8x256xf32> to vector<8x128xf32>
    %11 = arith.index_cast %c0_i32_1 : i32 to index
    %c0_8 = arith.constant 0 : index
    %c0_9 = arith.constant 0 : index
    %12 = vector.load %arg4[%11, %c0_8, %c0_9] : memref<4x8x128xf32, #tpu.memory_space<vmem>>, vector<1x8x128xf32>
    %13 = vector.shape_cast %12 : vector<1x8x128xf32> to vector<8x128xf32>
    %14 = vector.shape_cast %10 : vector<8x128xf32> to vector<1x8x128xf32>
    tpu.vector_store %arg4[%11, %c0_8, %c0_9], %14 {strides = array<i32>} : memref<4x8x128xf32, #tpu.memory_space<vmem>>, vector<1x8x128xf32>,
    %15 = vector.extract_strided_slice %9 {offsets = [0, 128], sizes = [8, 32], strides = [1, 1]} : vector<8x256xf32> to vector<8x32xf32>
    %c0_10 = arith.constant 0 : index
    %c0_11 = arith.constant 0 : index
    %16 = vector.load %arg6[%c0_10, %c0_11] : memref<8x128xf32, #tpu.memory_space<vmem>>, vector<8x32xf32>
    tpu.vector_store %arg6[%c0_10, %c0_11], %15 {strides = array<i32>} : memref<8x128xf32, #tpu.memory_space<vmem>>, vector<8x32xf32>,
    %c1_i32 = arith.constant 1 : i32
    %17 = arith.index_cast %c1_i32 : i32 to index
    %c0_12 = arith.constant 0 : index
    %c0_13 = arith.constant 0 : index
    %18 = vector.load %arg1[%17, %c0_12, %c0_13] : memref<4x8x4xf32, #tpu.memory_space<vmem>>, vector<1x8x4xf32>
    %19 = vector.shape_cast %18 : vector<1x8x4xf32> to vector<8x4xf32>
    %c0_14 = arith.constant 0 : index
    %c32_15 = arith.constant 32 : index
    %20 = vector.load %arg6[%c0_14, %c32_15] : memref<8x128xf32, #tpu.memory_space<vmem>>, vector<8x4xf32>
    tpu.vector_store %arg6[%c0_14, %c32_15], %19 {strides = array<i32>} : memref<8x128xf32, #tpu.memory_space<vmem>>, vector<8x4xf32>,
    %c0_16 = arith.constant 0 : index
    %c0_17 = arith.constant 0 : index
    %21 = vector.load %arg6[%c0_16, %c0_17] : memref<8x128xf32, #tpu.memory_space<vmem>>, vector<8x128xf32>
    %c0_18 = arith.constant 0 : index
    %c0_19 = arith.constant 0 : index
    %22 = vector.load %arg3[%c0_18, %c0_19] : memref<128x256xf32, #tpu.memory_space<vmem>>, vector<128x256xf32>
    %cst_20 = arith.constant dense<0.000000e+00> : vector<8x256xf32>
    %23 = tpu.matmul %21, %22, %cst_20 {dimension_numbers = #tpu.dot_dimension_numbers<[1], [0], [0], [1], [0, 0, 1, 1], [], []>} : vector<8x128xf32>, vector<128x256xf32>, vector<8x256xf32> -> vector<8x256xf32>
    %24 = vector.extract_strided_slice %23 {offsets = [0, 0], sizes = [8, 128], strides = [1, 1]} : vector<8x256xf32> to vector<8x128xf32>
    %25 = arith.index_cast %c1_i32 : i32 to index
    %c0_21 = arith.constant 0 : index
    %c0_22 = arith.constant 0 : index
    %26 = vector.load %arg4[%25, %c0_21, %c0_22] : memref<4x8x128xf32, #tpu.memory_space<vmem>>, vector<1x8x128xf32>
    %27 = vector.shape_cast %26 : vector<1x8x128xf32> to vector<8x128xf32>
    %28 = vector.shape_cast %24 : vector<8x128xf32> to vector<1x8x128xf32>
    tpu.vector_store %arg4[%25, %c0_21, %c0_22], %28 {strides = array<i32>} : memref<4x8x128xf32, #tpu.memory_space<vmem>>, vector<1x8x128xf32>,
    %29 = vector.extract_strided_slice %23 {offsets = [0, 128], sizes = [8, 32], strides = [1, 1]} : vector<8x256xf32> to vector<8x32xf32>
    %c0_23 = arith.constant 0 : index
    %c0_24 = arith.constant 0 : index
    %30 = vector.load %arg6[%c0_23, %c0_24] : memref<8x128xf32, #tpu.memory_space<vmem>>, vector<8x32xf32>
    tpu.vector_store %arg6[%c0_23, %c0_24], %29 {strides = array<i32>} : memref<8x128xf32, #tpu.memory_space<vmem>>, vector<8x32xf32>,
    %c2_i32 = arith.constant 2 : i32
    %31 = arith.index_cast %c2_i32 : i32 to index
    %c0_25 = arith.constant 0 : index
    %c0_26 = arith.constant 0 : index
    %32 = vector.load %arg1[%31, %c0_25, %c0_26] : memref<4x8x4xf32, #tpu.memory_space<vmem>>, vector<1x8x4xf32>
    %33 = vector.shape_cast %32 : vector<1x8x4xf32> to vector<8x4xf32>
    %c0_27 = arith.constant 0 : index
    %c32_28 = arith.constant 32 : index
    %34 = vector.load %arg6[%c0_27, %c32_28] : memref<8x128xf32, #tpu.memory_space<vmem>>, vector<8x4xf32>
    tpu.vector_store %arg6[%c0_27, %c32_28], %33 {strides = array<i32>} : memref<8x128xf32, #tpu.memory_space<vmem>>, vector<8x4xf32>,
    %c0_29 = arith.constant 0 : index
    %c0_30 = arith.constant 0 : index
    %35 = vector.load %arg6[%c0_29, %c0_30] : memref<8x128xf32, #tpu.memory_space<vmem>>, vector<8x128xf32>
    %c0_31 = arith.constant 0 : index
    %c0_32 = arith.constant 0 : index
    %36 = vector.load %arg3[%c0_31, %c0_32] : memref<128x256xf32, #tpu.memory_space<vmem>>, vector<128x256xf32>
    %cst_33 = arith.constant dense<0.000000e+00> : vector<8x256xf32>
    %37 = tpu.matmul %35, %36, %cst_33 {dimension_numbers = #tpu.dot_dimension_numbers<[1], [0], [0], [1], [0, 0, 1, 1], [], []>} : vector<8x128xf32>, vector<128x256xf32>, vector<8x256xf32> -> vector<8x256xf32>
    %38 = vector.extract_strided_slice %37 {offsets = [0, 0], sizes = [8, 128], strides = [1, 1]} : vector<8x256xf32> to vector<8x128xf32>
    %39 = arith.index_cast %c2_i32 : i32 to index
    %c0_34 = arith.constant 0 : index
    %c0_35 = arith.constant 0 : index
    %40 = vector.load %arg4[%39, %c0_34, %c0_35] : memref<4x8x128xf32, #tpu.memory_space<vmem>>, vector<1x8x128xf32>
    %41 = vector.shape_cast %40 : vector<1x8x128xf32> to vector<8x128xf32>
    %42 = vector.shape_cast %38 : vector<8x128xf32> to vector<1x8x128xf32>
    tpu.vector_store %arg4[%39, %c0_34, %c0_35], %42 {strides = array<i32>} : memref<4x8x128xf32, #tpu.memory_space<vmem>>, vector<1x8x128xf32>,
    %43 = vector.extract_strided_slice %37 {offsets = [0, 128], sizes = [8, 32], strides = [1, 1]} : vector<8x256xf32> to vector<8x32xf32>
    %c0_36 = arith.constant 0 : index
    %c0_37 = arith.constant 0 : index
    %44 = vector.load %arg6[%c0_36, %c0_37] : memref<8x128xf32, #tpu.memory_space<vmem>>, vector<8x32xf32>
    tpu.vector_store %arg6[%c0_36, %c0_37], %43 {strides = array<i32>} : memref<8x128xf32, #tpu.memory_space<vmem>>, vector<8x32xf32>,
    %c3_i32 = arith.constant 3 : i32
    %45 = arith.index_cast %c3_i32 : i32 to index
    %c0_38 = arith.constant 0 : index
    %c0_39 = arith.constant 0 : index
    %46 = vector.load %arg1[%45, %c0_38, %c0_39] : memref<4x8x4xf32, #tpu.memory_space<vmem>>, vector<1x8x4xf32>
    %47 = vector.shape_cast %46 : vector<1x8x4xf32> to vector<8x4xf32>
    %c0_40 = arith.constant 0 : index
    %c32_41 = arith.constant 32 : index
    %48 = vector.load %arg6[%c0_40, %c32_41] : memref<8x128xf32, #tpu.memory_space<vmem>>, vector<8x4xf32>
    tpu.vector_store %arg6[%c0_40, %c32_41], %47 {strides = array<i32>} : memref<8x128xf32, #tpu.memory_space<vmem>>, vector<8x4xf32>,
    %c0_42 = arith.constant 0 : index
    %c0_43 = arith.constant 0 : index
    %49 = vector.load %arg6[%c0_42, %c0_43] : memref<8x128xf32, #tpu.memory_space<vmem>>, vector<8x128xf32>
    %c0_44 = arith.constant 0 : index
    %c0_45 = arith.constant 0 : index
    %50 = vector.load %arg3[%c0_44, %c0_45] : memref<128x256xf32, #tpu.memory_space<vmem>>, vector<128x256xf32>
    %cst_46 = arith.constant dense<0.000000e+00> : vector<8x256xf32>
    %51 = tpu.matmul %49, %50, %cst_46 {dimension_numbers = #tpu.dot_dimension_numbers<[1], [0], [0], [1], [0, 0, 1, 1], [], []>} : vector<8x128xf32>, vector<128x256xf32>, vector<8x256xf32> -> vector<8x256xf32>
    %52 = vector.extract_strided_slice %51 {offsets = [0, 0], sizes = [8, 128], strides = [1, 1]} : vector<8x256xf32> to vector<8x128xf32>
    %53 = arith.index_cast %c3_i32 : i32 to index
    %c0_47 = arith.constant 0 : index
    %c0_48 = arith.constant 0 : index
    %54 = vector.load %arg4[%53, %c0_47, %c0_48] : memref<4x8x128xf32, #tpu.memory_space<vmem>>, vector<1x8x128xf32>
    %55 = vector.shape_cast %54 : vector<1x8x128xf32> to vector<8x128xf32>
    %56 = vector.shape_cast %52 : vector<8x128xf32> to vector<1x8x128xf32>
    tpu.vector_store %arg4[%53, %c0_47, %c0_48], %56 {strides = array<i32>} : memref<4x8x128xf32, #tpu.memory_space<vmem>>, vector<1x8x128xf32>,
    %57 = vector.extract_strided_slice %51 {offsets = [0, 128], sizes = [8, 32], strides = [1, 1]} : vector<8x256xf32> to vector<8x32xf32>
    %c0_49 = arith.constant 0 : index
    %c0_50 = arith.constant 0 : index
    %58 = vector.load %arg6[%c0_49, %c0_50] : memref<8x128xf32, #tpu.memory_space<vmem>>, vector<8x32xf32>
    tpu.vector_store %arg6[%c0_49, %c0_50], %57 {strides = array<i32>} : memref<8x128xf32, #tpu.memory_space<vmem>>, vector<8x32xf32>,
    %c4_i32 = arith.constant 4 : i32
    %c0_51 = arith.constant 0 : index
    %c0_52 = arith.constant 0 : index
    %59 = vector.load %arg6[%c0_51, %c0_52] : memref<8x128xf32, #tpu.memory_space<vmem>>, vector<8x32xf32>
    %c0_53 = arith.constant 0 : index
    %c0_54 = arith.constant 0 : index
    %60 = vector.load %arg5[%c0_53, %c0_54] : memref<8x32xf32, #tpu.memory_space<vmem>>, vector<8x32xf32>
    tpu.vector_store %arg5[%c0_53, %c0_54], %59 {strides = array<i32>} : memref<8x32xf32, #tpu.memory_space<vmem>>, vector<8x32xf32>,
    return
  }
  func.func @transform_0(%arg0: i32) -> (i32, i32, i32) {
    %c0_i32 = arith.constant 0 : i32
    %c0_i32_0 = arith.constant 0 : i32
    %c0_i32_1 = arith.constant 0 : i32
    return %arg0, %c0_i32, %c0_i32_0 : i32, i32, i32
  }
  func.func @transform_1(%arg0: i32) -> (i32, i32) {
    %c0_i32 = arith.constant 0 : i32
    %c0_i32_0 = arith.constant 0 : i32
    %c0_i32_1 = arith.constant 0 : i32
    return %c0_i32, %c0_i32_0 : i32, i32
  }
  func.func @transform_2(%arg0: i32) -> (i32, i32) {
    %c0_i32 = arith.constant 0 : i32
    %c0_i32_0 = arith.constant 0 : i32
    %c0_i32_1 = arith.constant 0 : i32
    return %c0_i32, %c0_i32_0 : i32, i32
  }
  func.func @transform_3(%arg0: i32) -> (i32, i32, i32) {
    %c0_i32 = arith.constant 0 : i32
    %c0_i32_0 = arith.constant 0 : i32
    %c0_i32_1 = arith.constant 0 : i32
    return %arg0, %c0_i32, %c0_i32_0 : i32, i32, i32
  }
  func.func @transform_4(%arg0: i32) -> (i32, i32) {
    %c0_i32 = arith.constant 0 : i32
    %c0_i32_0 = arith.constant 0 : i32
    %c0_i32_1 = arith.constant 0 : i32
    return %c0_i32, %c0_i32_0 : i32, i32
  }
}

</mosaic_0001>

<bundles_post_ra>
// kernel: tpu_custom_call.1
= control target key start
LH: loop header
LB: loop body
LE: loop exit
PB: predicated region body
PF: predicated region fallthrough
CT: control target
= control target key end

     0   :  { %10 = vsyncpa [#allocation4], 0  ;;  %s1441_s0 = inlined_call_operand.vmem [shape: f32[8,8,4], index: 0, kind: input, shape index: {}]   ;;  %s1442_s1 = inlined_call_operand.vmem [shape: f32[8,128], index: 1, kind: input, shape index: {}]   ;;  %s1443_s2 = inlined_call_operand.hbm [shape: f32[128,256], index: 2, kind: input, shape index: {}]   ;;  %s1444_s3 = inlined_call_operand.hbm [shape: f32[8,8,128], index: 3, kind: output, shape index: {0}]   ;;  %s1445_s4 = inlined_call_operand.hbm [shape: f32[8,32], index: 4, kind: output, shape index: {1}]  }
   0x1   :  { %11 = vsyncpa [#allocation5], 0 }
   0x2   :  { %13 = vsyncpa [#allocation5 + $0x1], 0 }
   0x3   :  { %14 = vsyncpa [#allocation8], 0  ;;  %s1162_s15 = smov 0   ;;  %s1164_s16 = smov 0  }
   0x4   :  { %s1166_s17 = smov 0   ;;  %s1168_s18 = smov 0  }
   0x5 LB: > { %s1183_s19 = sadd.s32 4294967295, %s1126_s18   ;;  %s787_s20 = sadd.s32 4294967294, %s1126_s18   ;;  %s1126_s18 = sphi %s1168_s18, %s1468_s18   ;;  %s1122_s17 = sphi %s1166_s17, %s1467_s17   ;;  %s1118_s16 = sphi %s1164_s16, %s1466_s16   ;;  %s1114_s15 = sphi %s1162_s15, %s1465_s15  }
   0x6   : > { %s1187_s21 = sadd.s32 1, %s1126_s18   ;;  %s95_s22 = sadd.s32 1, %s1122_s17 }
   0x7   : > { %s92_s23 = ssub.s32 %s1126_s18, %s1187_s21  ;;  %p105_p0 = scmp.ne.s32.totalorder %s1122_s17, %s1118_s16 }
   0x8   : > { %p93_p1 = scmp.eq.s32.totalorder %s92_s23, 0  ;;  %p1446_p2 = scmp.eq.s32.totalorder %s1183_s19, 1 }
   0x9   : > { %p111_p3 = scmp.ne.s32.totalorder %s1118_s16, %s1114_s15  ;;  %p112_p4 = scmp.eq.s32.totalorder %s787_s20, 1 }
   0xa   : > { %s1198_s24 = scalar_select %p93_p1, %s1122_s17, %s95_s22  }
   0xb   : > { %p1202_p5 = por %p1446_p2, %p105_p0  ;;  %p1206_p6 = por %p112_p4, %p111_p3 }
   0xc   : > { %p788_p7 = scmp.ge.s32.totalorder %s1126_s18, 1  ;;  %p140_p8 = scmp.lt.s32.totalorder %s1126_s18, 3 }
   0xd   : > { %s1450_s25 = scalar_select %p1202_p5, 1, 0 }
   0xe   : > { %s1451_s26 = scalar_select %p1206_p6, 1, 0 }
   0xf   : > { %p1447_p10 = scmp.eq.s32.totalorder %s1183_s19, 0  ;;  %p1214_p11 = pnand %p788_p7, %p140_p8 }
  0x10   : > { %s1128_s28 = smov [#allocation3]   ;;  %s1002_s7 = scalar_lea.hbm %s1443_s2, 4096 }
  0x11   : > { %s1452_s27 = scalar_select %p1214_p11, 1, 0 }
  0x12   : > { %s155_s29 = sshll.u32 %s1128_s28, 4  ;;  %p949_p12 = pneg %p1214_p11  ;;  %s156_s29 = int_to_ptr.vmem [resolvable:$true] %s155_s29 }
  0x13   : > { %p1003_p0 = scmp.ne.s32.totalorder %s1443_s2, %s1002_s7  ;;  %p1009_p7 = scmp.lt.u32.totalorder %s1002_s7, %s1443_s2 }
  0x14   : > { %p1222_p13 = pnand %p1447_p10, %p949_p12 }
  0x16   : > { %p1004_p1 = pneg %p1222_p13 }
  0x18   : > { %p1005_p3 = pnand %p1004_p1, %p1003_p0 }
  0x1a   : > { %p1006_p4 = pneg %p1005_p3 }
  0x1c   : > { %p1011_p8 = pnand %p1009_p7, %p1006_p4 }
  0x1e   : > { %1014 = shalt.err (!%p1011_p8)
}
  0x1f   : > { %s1015_s12 = scalar_lea.vmem %s156_s29, 4096  ;;  %p1023_p10 = scmp.lt.s32.totalorder %s156_s29, %s156_s29 }
  0x20   : > { %p1016_p12 = scmp.ne.s32.totalorder %s156_s29, %s1015_s12  ;;  %p1024_p6 = scmp.lt.s32.totalorder %s1015_s12, %s1015_s12 }
  0x22   : > { %p1018_p2 = pnand %p1016_p12, %p1004_p1  ;;  %p1025_p5 = por %p1024_p6, %p1023_p10 }
  0x24   : > { %p1019_p9 = pneg %p1018_p2 }
  0x26   : > { %p1026_p11 = pnand %p1025_p5, %p1019_p9 }
  0x28   : > { %1029 = shalt.err (!%p1026_p11)
}
  0x29   : > { %s1129_s13 = smov 256   ;;  %s1130_s14 = smov 16  }
  0x2a   : > { %952 = dma.hbm_to_vmem [thread:$0]  (!%p1222_p13), %s1443_s2, 4096, %s156_s29, [#allocation4], %s1129_s13, %s1129_s13, %s1130_s14  }
  0x2b   : > { %p1454_p0 = scmp.ne.s32.totalorder %s1452_s27, 0 }
  0x2c   : > { %p1455_p3 = scmp.eq.s32.totalorder (!%p1454_p0), %s1183_s19, 0 }
  0x2d   : > { %180 = sbr.rel (%p1454_p0) target bundleno = 1111 (0x457), region = 32 }
  0x34   : > { %1101 = dma.done.wait (%p1455_p3), [#allocation4], 4096   ;;  %p1456_p2 = pmov %p1455_p3 }
  0x35   : > { %s201_s23 = sand.u32 1, %s1118_s16   ;;  %s794_s28 = sshll.u32 %s1183_s19, 2 }
  0x36   : > { %1103 = vsyncadd (%p1456_p2), [#allocation4], 4294963200  ;;  %s793_s30 = sshll.u32 %s201_s23, 5  ;;  %p207_p5 = scmp.lt.s32.totalorder %s794_s28, 7 }
  0x37   : > { %s1257_s7 = scalar_lea.vmem [#allocation6], %s793_s30  ;;  %p1457_p6 = scmp.ne.s32.totalorder %s1183_s19, 0 }
  0x38   : > { %s1470_s28 = smov (!%p207_p5, %s794_s28), 7  ;;  %v217_v0 = vld [vmem:[%s1442_s1] sm:$0xff] (!%p1457_p6) }
  0x39   : > { %s795_s5 = sshll.u32 %s1470_s28, 3  ;;  %216 = sbr.rel (%p1457_p6) target bundleno = 64 (0x40), region = 40  ;;  %218 = vst [vmem:[#allocation2] sm:$0xff] (!%p1457_p6), %v217_v0 }
  0x3a   : > { %s1255_s27 = scalar_lea.vmem %s1441_s0, %s795_s5 }
  0x40 PF: > { %v219_v1 = vld [vmem:[%s1255_s27] sm:$0xff]  ;;  %v228_v2 = vld [vmem:[#allocation3 + $0x8] sm:$0xff]  ;;  %s1131_s10 = smov 32   ;;  %v227_v5 = vld [vmem:[#allocation3] sm:$0xff]  ;;  %v1132_v8 = vmov 0.0   ;;  %vm224_vm0 = vcmask 294144  }
  0x41   : > { %v230_v3 = vld [vmem:[#allocation3 + $0x18] sm:$0xff]  ;;  %221 = vrot.lane.b32.xlu0 %v219_v1, %s1131_s10  ;;  %v229_v6 = vld [vmem:[#allocation3 + $0x10] sm:$0xff]  ;;  %v232_v7 = vld [vmem:[#allocation3 + $0x28] sm:$0xff]  ;;  %323 = vmatprep.mubr.f32.mxu0 %v1132_v8  ;;  %vm331_vm1 = vcmask 261120   ;;  %s810_s11 = sshll.u32 %s1183_s19, 9  ;;  %s691_s12 = sshll.u32 %s1257_s7, 4  ;;  %s1371_s12 = int_to_ptr.vmem [resolvable:$true] %s691_s12 }
  0x42   : > { %v1266_v4 = vpack.c.bf16 %v230_v3, %v228_v2  ;;  %v1269_v9 = vpack.c.bf16 %v229_v6, %v227_v5  ;;  %v234_v10 = vld [vmem:[#allocation3 + $0x38] sm:$0xff]  ;;  %v231_v11 = vld [vmem:[#allocation3 + $0x20] sm:$0xff]  ;;  %v233_v12 = vld [vmem:[#allocation3 + $0x30] sm:$0xff]  ;;  %437 = vmatprep.mubr.f32.mxu1 %v1132_v8  ;;  %s1369_s20 = scalar_lea.hbm %s1444_s3, %s810_s11  ;;  %s1377_s22 = scalar_lea.sflag [#allocation5], %s201_s23 }
  0x43   : > { %v1273_v13 = vpack.c.bf16 %v234_v10, %v232_v7  ;;  %v236_v14 = vld [vmem:[#allocation3 + $0x48] sm:$0xff]  ;;  %v238_v15 = vld [vmem:[#allocation3 + $0x58] sm:$0xff]  ;;  %v1277_v16 = vpack.c.bf16 %v233_v12, %v231_v11  ;;  %v235_v18 = vld [vmem:[#allocation3 + $0x40] sm:$0xff]  ;;  %s1030_s28 = scalar_lea.vmem %s1371_s12, 512  ;;  %p1458_p10 = scmp.ne.s32.totalorder %s1450_s25, 0 }
  0x44   : > { %812 = vmatprep.subr.bf16.mxu0 %v1266_v4  ;;  %844 = vmatprep.subr.bf16.mxu1 %v1266_v4  ;;  %v1281_v17 = vpack.c.bf16 %v238_v15, %v236_v14  ;;  %v237_v19 = vld [vmem:[#allocation3 + $0x50] sm:$0xff]  ;;  %v240_v20 = vld [vmem:[#allocation3 + $0x68] sm:$0xff]  ;;  %v242_v21 = vld [vmem:[#allocation3 + $0x78] sm:$0xff]  ;;  %p1031_p9 = scmp.ne.s32.totalorder %s1371_s12, %s1030_s28  ;;  %s1133_s30 = smov [#allocation6]  }
  0x45   : > { %814 = vmatpush1.bf16.msra.mxu0 %v1269_v9  ;;  %846 = vmatpush1.bf16.msra.mxu1 %v1269_v9  ;;  %v1285_v22 = vpack.c.bf16 %v237_v19, %v235_v18  ;;  %v1289_v23 = vpack.c.bf16 %v242_v21, %v240_v20  ;;  %v239_v24 = vld [vmem:[#allocation3 + $0x60] sm:$0xff]  ;;  %v241_v25 = vld [vmem:[#allocation3 + $0x70] sm:$0xff]  ;;  %v244_v26 = vld [vmem:[#allocation3 + $0x88] sm:$0xff]  ;;  %s1034_s5 = sshll.u32 %s1133_s30, 4  ;;  %s1035_s5 = int_to_ptr.vmem [resolvable:$false] %s1034_s5 }
  0x46   : > { %816 = vmatprep.subr.bf16.mxu0 %v1273_v13  ;;  %848 = vmatprep.subr.bf16.mxu1 %v1273_v13  ;;  %v246_v27 = vld [vmem:[#allocation3 + $0x98] sm:$0xff]  ;;  %v797_v28 = vld [vmem:[%s1255_s27 + $0x8] sm:$0xff]  ;;  %v1294_v29 = vpack.c.bf16 %v241_v25, %v239_v24  ;;  %v245_v32 = vld [vmem:[#allocation3 + $0x90] sm:$0xff]  ;;  %p1032_p11 = pnand %p1031_p9, %p1458_p10  ;;  %s1036_s29 = scalar_lea.vmem %s1035_s5, 1024 }
  0x47   : > { %336 = vrot.lane.b32.xlu0 %v797_v28, %s1131_s10  ;;  %v1298_v30 = vpack.c.bf16 %v246_v27, %v244_v26  ;;  %v243_v31 = vld [vmem:[#allocation3 + $0x80] sm:$0xff]  ;;  %v248_v33 = vld [vmem:[#allocation3 + $0xa8] sm:$0xff]  ;;  %v250_v34 = vld [vmem:[#allocation3 + $0xb8] sm:$0xff]  ;;  %p1037_p1 = scmp.lt.s32.totalorder %s1371_s12, %s1035_s5  ;;  %p1038_p4 = scmp.lt.s32.totalorder %s1036_s29, %s1030_s28 }
  0x48   : > { %v1303_v35 = vpack.c.bf16 %v245_v32, %v243_v31  ;;  %v1306_v36 = vpack.c.bf16 %v250_v34, %v248_v33  ;;  %v247_v37 = vld [vmem:[#allocation3 + $0xa0] sm:$0xff]  ;;  %v249_v38 = vld [vmem:[#allocation3 + $0xb0] sm:$0xff]  ;;  %v252_v39 = vld [vmem:[#allocation3 + $0xc8] sm:$0xff]  ;;  %p1033_p13 = pneg %p1032_p11 }
  0x49   : > { %818 = vmatpush1.bf16.msra.mxu0 %v1277_v16  ;;  %850 = vmatpush1.bf16.msra.mxu1 %v1277_v16  ;;  %v254_v40 = vld [vmem:[#allocation3 + $0xd8] sm:$0xff]  ;;  %v1311_v41 = vpack.c.bf16 %v249_v38, %v247_v37  ;;  %v251_v43 = vld [vmem:[#allocation3 + $0xc0] sm:$0xff]  ;;  %v253_v44 = vld [vmem:[#allocation3 + $0xd0] sm:$0xff]  ;;  %p1039_p7 = por %p1038_p4, %p1037_p1 }
  0x4a   : > { %820 = vmatprep.subr.bf16.mxu0 %v1281_v17  ;;  %852 = vmatprep.subr.bf16.mxu1 %v1281_v17  ;;  %v1314_v42 = vpack.c.bf16 %v254_v40, %v252_v39  ;;  %v256_v45 = vld [vmem:[#allocation3 + $0xe8] sm:$0xff]  ;;  %v258_v46 = vld [vmem:[#allocation3 + $0xf8] sm:$0xff]  ;;  %v837_v47 = vpack.c.bf16 %v253_v44, %v251_v43  ;;  %v255_v49 = vld [vmem:[#allocation3 + $0xe0] sm:$0xff] }
  0x4b   : > { %v839_v48 = vpack.c.bf16 %v258_v46, %v256_v45  ;;  %v257_v50 = vld [vmem:[#allocation3 + $0xf0] sm:$0xff]  ;;  %v799_v54 = vld [vmem:[%s1255_s27 + $0x10] sm:$0xff]  ;;  %p1040_p8 = pnand %p1039_p7, %p1033_p13 }
  0x4c   : > { %v841_v51 = vpack.c.bf16 %v257_v50, %v255_v49  ;;  %450 = vrot.lane.b32.xlu1 %v799_v54, %s1131_s10  ;;  %v801_v59 = vld [vmem:[%s1255_s27 + $0x18] sm:$0xff] }
  0x4d   : > { %822 = vmatpush1.bf16.msra.mxu0 %v1285_v22  ;;  %854 = vmatpush1.bf16.msra.mxu1 %v1285_v22 }
  0x4e   : > { %824 = vmatprep.subr.bf16.mxu0 %v1289_v23  ;;  %856 = vmatprep.subr.bf16.mxu1 %v1289_v23 }
  0x50   : > { %564 = vrot.lane.b32.xlu1 %v801_v59, %s1131_s10 }
  0x51   : > { %826 = vmatpush1.bf16.msra.mxu0 %v1294_v29  ;;  %858 = vmatpush1.bf16.msra.mxu1 %v1294_v29 }
  0x52   : > { %828 = vmatprep.subr.bf16.mxu0 %v1298_v30  ;;  %860 = vmatprep.subr.bf16.mxu1 %v1298_v30 }
  0x55   : > { %830 = vmatpush1.bf16.msra.mxu0 %v1303_v35  ;;  %862 = vmatpush1.bf16.msra.mxu1 %v1303_v35 }
  0x56   : > { %832 = vmatprep.subr.bf16.mxu0 %v1306_v36  ;;  %864 = vmatprep.subr.bf16.mxu1 %v1306_v36 }
  0x59   : > { %834 = vmatpush1.bf16.msra.mxu0 %v1311_v41  ;;  %866 = vmatpush1.bf16.msra.mxu1 %v1311_v41 }
  0x5a   : > { %836 = vmatprep.subr.bf16.mxu0 %v1314_v42  ;;  %868 = vmatprep.subr.bf16.mxu1 %v1314_v42 }
  0x5d   : > { %838 = vmatpush1.bf16.msra.mxu0 %v837_v47  ;;  %870 = vmatpush1.bf16.msra.mxu1 %v837_v47 }
  0x5e   : > { %840 = vmatprep.subr.bf16.mxu0 %v839_v48  ;;  %872 = vmatprep.subr.bf16.mxu1 %v839_v48 }
  0x61   : > { %842 = vmatpush1.bf16.msra.mxu0 %v841_v51  ;;  %874 = vmatpush1.bf16.msra.mxu1 %v841_v51 }
  0x62   : > { %876 = vmatprep.subr.bf16.mxu0 %v1266_v4  ;;  %908 = vmatprep.subr.bf16.mxu1 %v1266_v4 }
  0xb3   : > { %v222_v52 = vpop.permute.xlu0 %221 }
  0xb4   : > { %225 = vst.msk [vmem:[#allocation2] sm:$0xff] %vm224_vm0, %v222_v52 }
  0xb9   : > { %v337_v56 = vpop.permute.xlu0 %336 }
  0xbb   : > { %v226_v53 = vld [vmem:[#allocation2] sm:$0xff] }
  0xbc   : > { %324 = vmatmul.mubr.f32.vlgmr.msra.gmra.mrb[0].mxu0 %v226_v53 }
  0xbd   : > { %878 = vmatpush1.bf16.msra.mxu0 %v1269_v9  ;;  %551 = vmatprep.mubr.f32.mxu0 %v1132_v8 }
  0xbe   : > { %880 = vmatprep.subr.bf16.mxu0 %v1273_v13  ;;  %v451_v61 = vpop.permute.xlu1 %450 }
  0xc1   : > { %882 = vmatpush1.bf16.msra.mxu0 %v1277_v16 }
  0xc2   : > { %884 = vmatprep.subr.bf16.mxu0 %v1281_v17  ;;  %v565_v1 = vpop.permute.xlu1 %564 }
  0xc5   : > { %886 = vmatpush1.bf16.msra.mxu0 %v1285_v22 }
  0xc6   : > { %888 = vmatprep.subr.bf16.mxu0 %v1289_v23 }
  0xc9   : > { %890 = vmatpush1.bf16.msra.mxu0 %v1294_v29 }
  0xca   : > { %892 = vmatprep.subr.bf16.mxu0 %v1298_v30 }
  0xcd   : > { %894 = vmatpush1.bf16.msra.mxu0 %v1303_v35 }
  0xce   : > { %896 = vmatprep.subr.bf16.mxu0 %v1306_v36 }
  0xd1   : > { %898 = vmatpush1.bf16.msra.mxu0 %v1311_v41 }
  0xd2   : > { %900 = vmatprep.subr.bf16.mxu0 %v1314_v42 }
  0xd5   : > { %902 = vmatpush1.bf16.msra.mxu0 %v837_v47 }
  0xd6   : > { %904 = vmatprep.subr.bf16.mxu0 %v839_v48 }
  0xd9   : > { %906 = vmatpush1.bf16.msra.mxu0 %v841_v51 }
 0x18f   : > { %v325_v55 = vpop.f32.mrb[0].mxu0 }
 0x190   : > { %330 = vst [vmem:[%s1257_s7] sm:$0xff] %v325_v55  ;;  %v327_v57 = vpop.f32.mrb[1].mxu0 }
 0x191   : > { %332 = vst.msk [vmem:[#allocation2] sm:$0xff] %vm331_vm1, %v327_v57 }
 0x192   : > { %339 = vst.msk [vmem:[#allocation2] sm:$0xff] %vm224_vm0, %v337_v56 }
 0x199   : > { %v340_v58 = vld [vmem:[#allocation2] sm:$0xff] }
 0x19a   : > { %438 = vmatmul.mubr.f32.vlgmr.msra.gmra.mrb[0].mxu1 %v340_v58 }
 0x19b   : > { %910 = vmatpush1.bf16.msra.mxu1 %v1269_v9  ;;  %665 = vmatprep.mubr.f32.mxu1 %v1132_v8 }
 0x19c   : > { %912 = vmatprep.subr.bf16.mxu1 %v1273_v13 }
 0x19f   : > { %914 = vmatpush1.bf16.msra.mxu1 %v1277_v16 }
 0x1a0   : > { %916 = vmatprep.subr.bf16.mxu1 %v1281_v17 }
 0x1a3   : > { %918 = vmatpush1.bf16.msra.mxu1 %v1285_v22 }
 0x1a4   : > { %920 = vmatprep.subr.bf16.mxu1 %v1289_v23 }
 0x1a7   : > { %922 = vmatpush1.bf16.msra.mxu1 %v1294_v29 }
 0x1a8   : > { %924 = vmatprep.subr.bf16.mxu1 %v1298_v30 }
 0x1ab   : > { %926 = vmatpush1.bf16.msra.mxu1 %v1303_v35 }
 0x1ac   : > { %928 = vmatprep.subr.bf16.mxu1 %v1306_v36 }
 0x1af   : > { %930 = vmatpush1.bf16.msra.mxu1 %v1311_v41 }
 0x1b0   : > { %932 = vmatprep.subr.bf16.mxu1 %v1314_v42 }
 0x1b3   : > { %934 = vmatpush1.bf16.msra.mxu1 %v837_v47 }
 0x1b4   : > { %936 = vmatprep.subr.bf16.mxu1 %v839_v48 }
 0x1b7   : > { %938 = vmatpush1.bf16.msra.mxu1 %v841_v51 }
 0x26d   : > { %v439_v60 = vpop.f32.mrb[0].mxu1 }
 0x26e   : > { %798 = vst [vmem:[%s1257_s7 + $0x8] sm:$0xff] %v439_v60  ;;  %v441_v62 = vpop.f32.mrb[1].mxu1 }
 0x26f   : > { %446 = vst.msk [vmem:[#allocation2] sm:$0xff] %vm331_vm1, %v441_v62 }
 0x270   : > { %453 = vst.msk [vmem:[#allocation2] sm:$0xff] %vm224_vm0, %v451_v61 }
 0x277   : > { %v454_v63 = vld [vmem:[#allocation2] sm:$0xff] }
 0x278   : > { %552 = vmatmul.mubr.f32.vlgmr.msra.gmra.mrb[2].mxu0 %v454_v63 }
 0x34b   : > { %v553_v0 = vpop.f32.mrb[2].mxu0 }
 0x34c   : > { %800 = vst [vmem:[%s1257_s7 + $0x10] sm:$0xff] %v553_v0  ;;  %v555_v2 = vpop.f32.mrb[3].mxu0 }
 0x34d   : > { %560 = vst.msk [vmem:[#allocation2] sm:$0xff] %vm331_vm1, %v555_v2 }
 0x34e   : > { %567 = vst.msk [vmem:[#allocation2] sm:$0xff] %vm224_vm0, %v565_v1 }
 0x355   : > { %v568_v3 = vld [vmem:[#allocation2] sm:$0xff] }
 0x356   : > { %666 = vmatmul.mubr.f32.vlgmr.msra.gmra.mrb[2].mxu1 %v568_v3 }
 0x429   : > { %v667_v4 = vpop.f32.mrb[2].mxu1 }
 0x42a   : > { %802 = vst [vmem:[%s1257_s7 + $0x18] sm:$0xff] %v667_v4  ;;  %v669_v5 = vpop.f32.mrb[3].mxu1 }
 0x42b   : > { %674 = vst.msk [vmem:[#allocation2] sm:$0xff] %vm331_vm1, %v669_v5 }
 0x42c   : > { %1043 = shalt.err (!%p1040_p8)
}
 0x42d   : > { %s1044_s23 = scalar_lea.hbm %s1369_s20, 512  ;;  %s1048_s7 = scalar_lea.hbm %s1444_s3, 1024 }
 0x42e   : > { %p1045_p12 = scmp.ne.s32.totalorder %s1369_s20, %s1044_s23  ;;  %p1049_p2 = scmp.lt.u32.totalorder %s1369_s20, %s1444_s3 }
 0x42f   : > { %p1050_p5 = scmp.lt.u32.totalorder %s1048_s7, %s1044_s23  ;;  %p1052_p9 = scmp.lt.u32.totalorder %s1044_s23, %s1369_s20 }
 0x430   : > { %p1046_p0 = pnand %p1045_p12, %p1458_p10 }
 0x431   : > { %p1051_p6 = por %p1050_p5, %p1049_p2 }
 0x432   : > { %p1047_p3 = pneg %p1046_p0 }
 0x433   : > { %p1053_p11 = por %p1052_p9, %p1051_p6 }
 0x435   : > { %p1054_p13 = pnand %p1053_p11, %p1047_p3 }
 0x437   : > { %1057 = shalt.err (!%p1054_p13)
}
 0x438   : > { %s1134_s10 = smov 128   ;;  %s1135_s11 = smov 8   ;;  %v675_v6 = vld [vmem:[#allocation2] sm:$0xff] }
 0x439   : > { %943 = dma.vmem_to_hbm [thread:$0]  (%p1458_p10), %s1371_s12, 512, %s1369_s20, %s1377_s22, %s1134_s10, %s1134_s10, %s1135_s11   ;;  %676 = vst.msk [vmem:[#allocation7] sm:$0xff] %vm331_vm1, %v675_v6 }
 0x43a   : > { %s1136_s13 = smov [#allocation7]   ;;  %p1459_p4 = scmp.eq.s32.totalorder %s1183_s19, 1 }
 0x43b   : > { %s705_s14 = sshll.u32 %s1136_s13, 4  ;;  %s706_s14 = int_to_ptr.vmem [resolvable:$true] %s705_s14 }
 0x43c   : > { %s1058_s28 = scalar_lea.vmem %s706_s14, 128  ;;  %p1065_p12 = scmp.lt.s32.totalorder %s706_s14, %s706_s14 }
 0x43d   : > { %p1059_p1 = scmp.ne.s32.totalorder %s706_s14, %s1058_s28  ;;  %p1066_p0 = scmp.lt.s32.totalorder %s1058_s28, %s1058_s28 }
 0x43f   : > { %p1060_p7 = pnand %p1059_p1, %p1459_p4  ;;  %p1067_p3 = por %p1066_p0, %p1065_p12 }
 0x441   : > { %p1061_p8 = pneg %p1060_p7 }
 0x443   : > { %p1068_p2 = pnand %p1067_p3, %p1061_p8 }
 0x445   : > { %1071 = shalt.err (!%p1068_p2)
}
 0x446   : > { %s1072_s25 = scalar_lea.hbm %s1445_s4, 128  ;;  %p1460_p5 = pmov %p1459_p4 }
 0x447   : > { %p1073_p10 = scmp.ne.s32.totalorder %s1445_s4, %s1072_s25  ;;  %p1078_p11 = scmp.lt.u32.totalorder %s1072_s25, %s1445_s4 }
 0x449   : > { %p1074_p6 = pnand %p1073_p10, %p1460_p5 }
 0x44b   : > { %p1075_p9 = pneg %p1074_p6 }
 0x44d   : > { %p1080_p13 = pnand %p1078_p11, %p1075_p9 }
 0x44f   : > { %1083 = shalt.err (!%p1080_p13)
}
 0x450   : > { %p1461_p1 = pmov %p1459_p4 }
 0x452   : > { %945 = dma.vmem_to_hbm [thread:$0]  (%p1461_p1), %s706_s14, 128, %s1445_s4, [#allocation8]  }
 0x453   : > { %p1462_p4 = pmov %p1461_p1 }
 0x454   : > { %p1463_p7 = pmov %p1461_p1 }
 0x455   : > { %1105 = dma.done.wait (%p1462_p4), [#allocation8], 128  }
 0x456   : > { %1107 = vsyncadd (%p1463_p7), [#allocation8], 4294967168 }
 0x457 PF: > { %p961_p8 = scmp.ge.s32.totalorder %s1126_s18, 2  ;;  %s721_s27 = sand.u32 1, %s1114_s15  }
 0x458   : > { %p1464_p12 = scmp.ne.s32.totalorder %s1451_s26, 0  ;;  %s722_s7 = scalar_lea.sflag [#allocation5], %s721_s27 }
 0x45a   : > { %p954_p0 = pnand %p961_p8, %p1464_p12 }
 0x45c   : > { %1109 = dma.done.wait (!%p954_p0), %s722_s7, 512  }
 0x45d   : > { %1111 = vsyncadd (!%p954_p0), %s722_s7, 4294966784  ;;  %p17_p3 = scmp.ge.s32.totalorder %s1187_s21, 4   ;;  %s1465_s15 = smov %s1118_s16 }
 0x45e   : > { %s1466_s16 = smov %s1122_s17  ;;  %s1467_s17 = smov %s1198_s24 }
 0x45f   : > { %s1468_s18 = smov %s1187_s21  ;;  %19 = sbr.rel (!%p17_p3) target bundleno = 5 (0x5), region = 90 }
 0x466   :  { %727 = vsyncpa [#allocation4], 1 }
 0x467   :  { %729 = vsyncpa [#allocation4 + $0x1], 1 }
 0x468   :  { %730 = vsyncpa [#allocation5], 1 }
 0x469   :  { %732 = vsyncpa [#allocation5 + $0x1], 1 }
 0x46a   :  { %733 = vsyncpa [#allocation8], 1 }

</bundles_post_ra>
